<compile_context>
chip_gen: v5e
topology: v5e:2x2
jax: 0.10.0
libtpu: 0.0.40
codegen_flags: <defaults>
</compile_context>

<pallas_src>
import jax
import jax.numpy as jnp
from jax.experimental import pallas as pl
from jax.experimental.pallas import tpu as pltpu

LANE = 128          # TPU lane width / MXU-friendly hidden-dim padding
IN_DIM = 28 * 28    # 784
H1, H2, OUT = 120, 84, 10
TB_MAX = 2048       # max batch-tile rows (x f32 tile 6.1 MiB, double-buffered)


def _round_up(n: int, m: int) -> int:
    return ((n + m - 1) // m) * m


def _pad2d(a, rows, cols):
    return jnp.pad(a, ((0, rows - a.shape[0]), (0, cols - a.shape[1])))


def mlp_kernel(x_ref, w1_ref, b1_ref, w2_ref, b2_ref, w3_ref, b3_ref, o_ref):
    # x_ref: (tb, 784) f32 — cast to bf16 in-kernel for the MXU.
    # Weights bf16 (lane-padded), biases f32.  Accumulate in f32.
    x = x_ref[...].astype(jnp.bfloat16)
    h1 = jnp.dot(x, w1_ref[...], preferred_element_type=jnp.float32)
    h1 = jnp.maximum(h1 + b1_ref[...], 0.0)                       # f32 epilogue
    h2 = jnp.dot(h1.astype(jnp.bfloat16), w2_ref[...],
                 preferred_element_type=jnp.float32)
    h2 = jnp.maximum(h2 + b2_ref[...], 0.0)                       # f32 epilogue
    o_ref[...] = jnp.dot(h2.astype(jnp.bfloat16), w3_ref[...],
                         preferred_element_type=jnp.float32) + b3_ref[...]


def prepare_params(params):
    """One-time lane-pad + bf16 cast of the tiny weights (hoisted out of the
    per-call path).  Zero padding is numerically exact."""
    return dict(
        w1=_pad2d(params["w1"], IN_DIM, LANE).astype(jnp.bfloat16),  # (784, 128)
        w2=_pad2d(params["w2"], LANE, LANE).astype(jnp.bfloat16),    # (128, 128)
        w3=_pad2d(params["w3"], LANE, OUT).astype(jnp.bfloat16),     # (128, 10)
        b1=_pad2d(params["b1"], 1, LANE),                            # (1, 128) f32
        b2=_pad2d(params["b2"], 1, LANE),                            # (1, 128) f32
        b3=params["b3"],                                             # (1, 10)  f32
    )


def mlp_forward(x, prepared):
    """x: (B, 1, 28, 28) or (B, 784) float32.  Returns (B, 10) float32."""
    x2d = x.reshape(-1, IN_DIM)                                   # input.view(-1, 784)
    B = x2d.shape[0]

    # Batch tile: large enough to amortize the ~0.35 us/step grid overhead,
    # capped to ceil(B/2) so the grid has >= 2 steps when B is large enough
    # (lets "parallel" shard the batch across v7x's two TensorCores).
    tb = min(TB_MAX, _round_up(pl.cdiv(B, 2), 8))
    if tb >= B:
        tb = B            # single block == full array (always a legal block shape)
    grid = (pl.cdiv(B, tb),)

    resident = lambda i: (0, 0)   # weights/biases: same block every grid step

    flops = 2 * B * (IN_DIM * LANE + LANE * LANE + LANE * OUT)
    bytes_accessed = (x2d.size * 4 + B * OUT * 4
                      + (IN_DIM * LANE + LANE * LANE + LANE * OUT) * 2
                      + (2 * LANE + OUT) * 4)

    return pl.pallas_call(
        mlp_kernel,
        out_shape=jax.ShapeDtypeStruct((B, OUT), jnp.float32),
        grid=grid,
        in_specs=[
            pl.BlockSpec((tb, IN_DIM), lambda i: (i, 0)),   # x (streamed, f32)
            pl.BlockSpec((IN_DIM, LANE), resident),         # w1
            pl.BlockSpec((1, LANE), resident),              # b1
            pl.BlockSpec((LANE, LANE), resident),           # w2
            pl.BlockSpec((1, LANE), resident),              # b2
            pl.BlockSpec((LANE, OUT), resident),            # w3
            pl.BlockSpec((1, OUT), resident),               # b3
        ],
        out_specs=pl.BlockSpec((tb, OUT), lambda i: (i, 0)),
        compiler_params=pltpu.CompilerParams(
            dimension_semantics=("parallel",),
            vmem_limit_bytes=32 * 1024 * 1024,
        ),
        cost_estimate=pl.CostEstimate(
            flops=flops, transcendentals=0, bytes_accessed=bytes_accessed),
    )(x2d, prepared["w1"], prepared["b1"], prepared["w2"], prepared["b2"],
      prepared["w3"], prepared["b3"])


def init_params(key):
    """Deterministic init matching nn.Linear default: U(-1/sqrt(fan_in), +1/sqrt(fan_in)).

    Weights stored (in_features, out_features) so forward is x @ W + b,
    equivalent to PyTorch's x @ W.T + b with W of shape (out, in).
    """
    dims = [(IN_DIM, H1), (H1, H2), (H2, OUT)]
    params = {}
    for idx, (fan_in, fan_out) in enumerate(dims, start=1):
        key, kw, kb = jax.random.split(key, 3)
        bound = 1.0 / (fan_in ** 0.5)
        params[f"w{idx}"] = jax.random.uniform(
            kw, (fan_in, fan_out), jnp.float32, minval=-bound, maxval=bound)
        params[f"b{idx}"] = jax.random.uniform(
            kb, (1, fan_out), jnp.float32, minval=-bound, maxval=bound)
    return params


def reference_forward(x, params):
    """Pure-JAX reference with the same bf16-operand / f32-accumulate recipe."""
    x2d = x.reshape(-1, IN_DIM)
    w1 = params["w1"].astype(jnp.bfloat16)
    w2 = params["w2"].astype(jnp.bfloat16)
    w3 = params["w3"].astype(jnp.bfloat16)
    h1 = jnp.maximum(
        jnp.dot(x2d.astype(jnp.bfloat16), w1,
                preferred_element_type=jnp.float32) + params["b1"], 0.0)
    h2 = jnp.maximum(
        jnp.dot(h1.astype(jnp.bfloat16), w2,
                preferred_element_type=jnp.float32) + params["b2"], 0.0)
    return (jnp.dot(h2.astype(jnp.bfloat16), w3,
                    preferred_element_type=jnp.float32) + params["b3"])


if __name__ == "__main__":
    key = jax.random.PRNGKey(0)
    key, kx = jax.random.split(key)
    # Small MNIST-like batch: (B, C, H, W) = (2, 1, 28, 28)
    x = jax.random.normal(kx, (2, 1, 28, 28), jnp.float32)
    params = init_params(key)
    prepared = prepare_params(params)

    fwd = jax.jit(mlp_forward)
    out = fwd(x, prepared)
    out = jax.block_until_ready(out)

    ref = reference_forward(x, params)
    assert out.shape == (2, 10), out.shape
    assert jnp.allclose(out, ref, atol=1e-2, rtol=1e-2), "mismatch vs JAX reference"

    print("KERNEL_OK")
</pallas_src>

<mosaic_0001>
module attributes {stable_mosaic.version = 11 : i64} {
  func.func @mlp_kernel(%arg0: i32, %arg1: memref<2x784xf32, #tpu.memory_space<vmem>>, %arg2: memref<784x128xbf16, #tpu.memory_space<vmem>>, %arg3: memref<1x128xf32, #tpu.memory_space<vmem>>, %arg4: memref<128x128xbf16, #tpu.memory_space<vmem>>, %arg5: memref<1x128xf32, #tpu.memory_space<vmem>>, %arg6: memref<128x10xbf16, #tpu.memory_space<vmem>>, %arg7: memref<1x10xf32, #tpu.memory_space<vmem>>, %arg8: memref<2x10xf32, #tpu.memory_space<vmem>>) attributes {dimension_semantics = [#tpu.dimension_semantics<parallel>], iteration_bounds = array<i64: 1>, scalar_prefetch = 0 : i64, scratch_operands = 0 : i64, tpu.core_type = #tpu.core_type<tc>, window_params = [{transform_indices = @transform_0, window_bounds = array<i64: 2, 784>}, {pipeline_mode = #tpu.pipeline_mode<synchronous>, transform_indices = @transform_1, window_bounds = array<i64: 784, 128>}, {pipeline_mode = #tpu.pipeline_mode<synchronous>, transform_indices = @transform_2, window_bounds = array<i64: 1, 128>}, {pipeline_mode = #tpu.pipeline_mode<synchronous>, transform_indices = @transform_3, window_bounds = array<i64: 128, 128>}, {pipeline_mode = #tpu.pipeline_mode<synchronous>, transform_indices = @transform_4, window_bounds = array<i64: 1, 128>}, {pipeline_mode = #tpu.pipeline_mode<synchronous>, transform_indices = @transform_5, window_bounds = array<i64: 128, 10>}, {pipeline_mode = #tpu.pipeline_mode<synchronous>, transform_indices = @transform_6, window_bounds = array<i64: 1, 10>}, {transform_indices = @transform_7, window_bounds = array<i64: 2, 10>}]} {
    %c0 = arith.constant 0 : index
    %c0_0 = arith.constant 0 : index
    %0 = vector.load %arg1[%c0, %c0_0] : memref<2x784xf32, #tpu.memory_space<vmem>>, vector<2x784xf32>
    %1 = arith.truncf %0 : vector<2x784xf32> to vector<2x784xbf16>
    %c0_1 = arith.constant 0 : index
    %c0_2 = arith.constant 0 : index
    %2 = vector.load %arg2[%c0_1, %c0_2] : memref<784x128xbf16, #tpu.memory_space<vmem>>, vector<784x128xbf16>
    %cst = arith.constant dense<0.000000e+00> : vector<2x128xf32>
    %3 = tpu.matmul %1, %2, %cst {dimension_numbers = #tpu.dot_dimension_numbers<[1], [0], [0], [1], [0, 0, 1, 1], [], []>} : vector<2x784xbf16>, vector<784x128xbf16>, vector<2x128xf32> -> vector<2x128xf32>
    %c0_3 = arith.constant 0 : index
    %c0_4 = arith.constant 0 : index
    %4 = vector.load %arg3[%c0_3, %c0_4] : memref<1x128xf32, #tpu.memory_space<vmem>>, vector<1x128xf32>
    %5 = vector.broadcast %4 : vector<1x128xf32> to vector<2x128xf32>
    %6 = arith.addf %3, %5 : vector<2x128xf32>
    %cst_5 = arith.constant 0.000000e+00 : f32
    %7 = vector.broadcast %cst_5 : f32 to vector<2x128xf32>
    %8 = arith.maximumf %6, %7 : vector<2x128xf32>
    %9 = arith.truncf %8 : vector<2x128xf32> to vector<2x128xbf16>
    %c0_6 = arith.constant 0 : index
    %c0_7 = arith.constant 0 : index
    %10 = vector.load %arg4[%c0_6, %c0_7] : memref<128x128xbf16, #tpu.memory_space<vmem>>, vector<128x128xbf16>
    %cst_8 = arith.constant dense<0.000000e+00> : vector<2x128xf32>
    %11 = tpu.matmul %9, %10, %cst_8 {dimension_numbers = #tpu.dot_dimension_numbers<[1], [0], [0], [1], [0, 0, 1, 1], [], []>} : vector<2x128xbf16>, vector<128x128xbf16>, vector<2x128xf32> -> vector<2x128xf32>
    %c0_9 = arith.constant 0 : index
    %c0_10 = arith.constant 0 : index
    %12 = vector.load %arg5[%c0_9, %c0_10] : memref<1x128xf32, #tpu.memory_space<vmem>>, vector<1x128xf32>
    %13 = vector.broadcast %12 : vector<1x128xf32> to vector<2x128xf32>
    %14 = arith.addf %11, %13 : vector<2x128xf32>
    %cst_11 = arith.constant 0.000000e+00 : f32
    %15 = vector.broadcast %cst_11 : f32 to vector<2x128xf32>
    %16 = arith.maximumf %14, %15 : vector<2x128xf32>
    %17 = arith.truncf %16 : vector<2x128xf32> to vector<2x128xbf16>
    %c0_12 = arith.constant 0 : index
    %c0_13 = arith.constant 0 : index
    %18 = vector.load %arg6[%c0_12, %c0_13] : memref<128x10xbf16, #tpu.memory_space<vmem>>, vector<128x10xbf16>
    %cst_14 = arith.constant dense<0.000000e+00> : vector<2x10xf32>
    %19 = tpu.matmul %17, %18, %cst_14 {dimension_numbers = #tpu.dot_dimension_numbers<[1], [0], [0], [1], [0, 0, 1, 1], [], []>} : vector<2x128xbf16>, vector<128x10xbf16>, vector<2x10xf32> -> vector<2x10xf32>
    %c0_15 = arith.constant 0 : index
    %c0_16 = arith.constant 0 : index
    %20 = vector.load %arg7[%c0_15, %c0_16] : memref<1x10xf32, #tpu.memory_space<vmem>>, vector<1x10xf32>
    %21 = vector.broadcast %20 : vector<1x10xf32> to vector<2x10xf32>
    %22 = arith.addf %19, %21 : vector<2x10xf32>
    %c0_17 = arith.constant 0 : index
    %c0_18 = arith.constant 0 : index
    %23 = vector.load %arg8[%c0_17, %c0_18] : memref<2x10xf32, #tpu.memory_space<vmem>>, vector<2x10xf32>
    tpu.vector_store %arg8[%c0_17, %c0_18], %22 {strides = array<i32>} : memref<2x10xf32, #tpu.memory_space<vmem>>, vector<2x10xf32>,
    return
  }
  func.func @transform_0(%arg0: i32) -> (i32, i32) {
    %c0_i32 = arith.constant 0 : i32
    %c0_i32_0 = arith.constant 0 : i32
    return %arg0, %c0_i32 : i32, i32
  }
  func.func @transform_1(%arg0: i32) -> (i32, i32) {
    %c0_i32 = arith.constant 0 : i32
    %c0_i32_0 = arith.constant 0 : i32
    %c0_i32_1 = arith.constant 0 : i32
    return %c0_i32, %c0_i32_0 : i32, i32
  }
  func.func @transform_2(%arg0: i32) -> (i32, i32) {
    %c0_i32 = arith.constant 0 : i32
    %c0_i32_0 = arith.constant 0 : i32
    %c0_i32_1 = arith.constant 0 : i32
    return %c0_i32, %c0_i32_0 : i32, i32
  }
  func.func @transform_3(%arg0: i32) -> (i32, i32) {
    %c0_i32 = arith.constant 0 : i32
    %c0_i32_0 = arith.constant 0 : i32
    %c0_i32_1 = arith.constant 0 : i32
    return %c0_i32, %c0_i32_0 : i32, i32
  }
  func.func @transform_4(%arg0: i32) -> (i32, i32) {
    %c0_i32 = arith.constant 0 : i32
    %c0_i32_0 = arith.constant 0 : i32
    %c0_i32_1 = arith.constant 0 : i32
    return %c0_i32, %c0_i32_0 : i32, i32
  }
  func.func @transform_5(%arg0: i32) -> (i32, i32) {
    %c0_i32 = arith.constant 0 : i32
    %c0_i32_0 = arith.constant 0 : i32
    %c0_i32_1 = arith.constant 0 : i32
    return %c0_i32, %c0_i32_0 : i32, i32
  }
  func.func @transform_6(%arg0: i32) -> (i32, i32) {
    %c0_i32 = arith.constant 0 : i32
    %c0_i32_0 = arith.constant 0 : i32
    %c0_i32_1 = arith.constant 0 : i32
    return %c0_i32, %c0_i32_0 : i32, i32
  }
  func.func @transform_7(%arg0: i32) -> (i32, i32) {
    %c0_i32 = arith.constant 0 : i32
    %c0_i32_0 = arith.constant 0 : i32
    return %arg0, %c0_i32 : i32, i32
  }
}

</mosaic_0001>

<bundles_post_ra>
// kernel: mlp_forward.1
= control target key start
LH: loop header
LB: loop body
LE: loop exit
PB: predicated region body
PF: predicated region fallthrough
CT: control target
= control target key end

     0   :  { %12 = vsyncpa [#allocation3], 0  ;;  %s1246_s0 = inlined_call_operand.vmem [shape: f32[2,784], index: 0, kind: input, shape index: {}]   ;;  %s1247_s1 = inlined_call_operand.hbm [shape: bf16[784,128], index: 1, kind: input, shape index: {}]   ;;  %s1248_s2 = inlined_call_operand.vmem [shape: f32[1,128], index: 2, kind: input, shape index: {}]   ;;  %s1249_s3 = inlined_call_operand.vmem [shape: bf16[128,128], index: 3, kind: input, shape index: {}]   ;;  %s1250_s4 = inlined_call_operand.vmem [shape: f32[1,128], index: 4, kind: input, shape index: {}]   ;;  %s1251_s5 = inlined_call_operand.vmem [shape: bf16[128,10], index: 5, kind: input, shape index: {}]   ;;  %s1252_s6 = inlined_call_operand.vmem [shape: f32[1,10], index: 6, kind: input, shape index: {}]   ;;  %s1253_s7 = inlined_call_operand.hbm [shape: f32[2,10], index: 7, kind: output, shape index: {}]  }
   0x1   :  { %13 = vsyncpa [#allocation4], 0  ;;  %s20_s26 = sshll.u32 %s1247_s1, 4  ;;  %s1133_s27 = smov [#allocation2]   ;;  %s21_s26 = int_to_ptr.hbm [resolvable:$true] %s20_s26 }
   0x2   :  { %s22_s28 = sshll.u32 %s1133_s27, 4  ;;  %s1134_s29 = smov 64   ;;  %s23_s28 = int_to_ptr.vmem [resolvable:$true] %s22_s28 }
   0x3   :  { %s1135_s30 = smov 4  }
   0x4   :  { %28 = dma.hbm_to_vmem [thread:$0]  %s21_s26, 6272, %s23_s28, [#allocation3], %s1134_s29, %s1134_s29, %s1135_s30  }
   0x5   :  { %1129 = dma.done.wait [#allocation3], 6272  }
   0x6   :  { %1130 = vsyncadd [#allocation3], 4294961024  ;;  %v1016_v0 = vld [vmem:[#allocation2 + $0x38] sm:$0xff]  ;;  %v1015_v3 = vld [vmem:[#allocation2 + $0x30] sm:$0xff]  ;;  %vm468_vm0 = vcmask 130048   ;;  %s1136_s21 = smov [#allocation5]  }
   0x7   :  { %v1024_v1 = vld [vmem:[#allocation2 + $0x78] sm:$0xff]  ;;  %472 = vmatpush.bf16.msra.mxu0 %v1016_v0  ;;  %v1023_v4 = vld [vmem:[#allocation2 + $0x70] sm:$0xff]  ;;  %v1014_v8 = vld [vmem:[#allocation2 + $0x28] sm:$0xff]  ;;  %s736_s22 = sshll.u32 %s1136_s21, 4  ;;  %vm729_vm1 = vcmask 74752   ;;  %s737_s22 = int_to_ptr.vmem [resolvable:$true] %s736_s22 }
   0x8   :  { %v1032_v2 = vld [vmem:[#allocation2 + $0xb8] sm:$0xff]  ;;  %485 = vmatpush.bf16.msra.mxu1 %v1024_v1  ;;  %v1031_v5 = vld [vmem:[#allocation2 + $0xb0] sm:$0xff]  ;;  %v1022_v9 = vld [vmem:[#allocation2 + $0x68] sm:$0xff] }
   0x9   :  { %498 = vmatpush.bf16.msra.mxu2 %v1032_v2  ;;  %v1040_v6 = vld [vmem:[#allocation2 + $0xf8] sm:$0xff]  ;;  %v1039_v7 = vld [vmem:[#allocation2 + $0xf0] sm:$0xff]  ;;  %v1030_v10 = vld [vmem:[#allocation2 + $0xa8] sm:$0xff] }
   0xa   :  { %511 = vmatpush.bf16.msra.mxu3 %v1040_v6  ;;  %v1038_v11 = vld [vmem:[#allocation2 + $0xe8] sm:$0xff]  ;;  %v1013_v12 = vld [vmem:[#allocation2 + $0x20] sm:$0xff]  ;;  %v44_v15 = vld [vmem:[%s1246_s0] sm:$0xff] }
   0xb   :  { %473 = vmatpush.bf16.msra.mxu0 %v1015_v3  ;;  %v1021_v13 = vld [vmem:[#allocation2 + $0x60] sm:$0xff]  ;;  %48 = vst [vmem:[#allocation1] ss:$4 sm:$0xff] %v44_v15  ;;  %v1012_v17 = vld [vmem:[#allocation2 + $0x18] sm:$0xff]  ;;  %v1011_v22 = vld [vmem:[#allocation2 + $0x10] sm:$0xff] }
   0xc   :  { %486 = vmatpush.bf16.msra.mxu1 %v1023_v4  ;;  %v1029_v14 = vld [vmem:[#allocation2 + $0xa0] sm:$0xff]  ;;  %v1020_v18 = vld [vmem:[#allocation2 + $0x58] sm:$0xff]  ;;  %v1019_v23 = vld [vmem:[#allocation2 + $0x50] sm:$0xff] }
   0xd   :  { %499 = vmatpush.bf16.msra.mxu2 %v1031_v5  ;;  %v1037_v16 = vld [vmem:[#allocation2 + $0xe0] sm:$0xff]  ;;  %v1028_v20 = vld [vmem:[#allocation2 + $0x98] sm:$0xff]  ;;  %v1027_v24 = vld [vmem:[#allocation2 + $0x90] sm:$0xff] }
   0xe   :  { %512 = vmatpush.bf16.msra.mxu3 %v1039_v7  ;;  %v45_v19 = vld [vmem:[%s1246_s0 + $0x8] sm:$0x3f]  ;;  %v1036_v21 = vld [vmem:[#allocation2 + $0xd8] sm:$0xff]  ;;  %v1035_v25 = vld [vmem:[#allocation2 + $0xd0] sm:$0xff] }
   0xf   :  { %474 = vmatpush.bf16.msra.mxu0 %v1014_v8  ;;  %50 = vst [vmem:[#allocation1 + $0x20] ss:$4 sm:$0xff] %v45_v19  ;;  %v1010_v26 = vld [vmem:[#allocation2 + $0x8] sm:$0xff]  ;;  %v1009_v29 = vld [vmem:[#allocation2] sm:$0xff]  ;;  %v1048_v34 = vld [vmem:[#allocation2 + $0x138] sm:$0xff] }
  0x10   :  { %487 = vmatpush.bf16.msra.mxu1 %v1022_v9  ;;  %v1018_v27 = vld [vmem:[#allocation2 + $0x48] sm:$0xff]  ;;  %v1017_v30 = vld [vmem:[#allocation2 + $0x40] sm:$0xff]  ;;  %v1056_v35 = vld [vmem:[#allocation2 + $0x178] sm:$0xff] }
  0x11   :  { %500 = vmatpush.bf16.msra.mxu2 %v1030_v10  ;;  %v1026_v28 = vld [vmem:[#allocation2 + $0x88] sm:$0xff]  ;;  %v1025_v36 = vld [vmem:[#allocation2 + $0x80] sm:$0xff]  ;;  %v1047_v43 = vld [vmem:[#allocation2 + $0x130] sm:$0xff] }
  0x12   :  { %513 = vmatpush.bf16.msra.mxu3 %v1038_v11  ;;  %v1034_v31 = vld [vmem:[#allocation2 + $0xc8] sm:$0xff]  ;;  %v51_v32 = vld.sshfl [vmem:[#allocation1] sm:$0xff pattern:$0x73625140]  ;;  %v1033_v40 = vld [vmem:[#allocation2 + $0xc0] sm:$0xff] }
  0x13   :  { %475 = vmatpush.bf16.msra.mxu0 %v1013_v12  ;;  %v52_v33 = vld.sshfl [vmem:[#allocation1 + $0x8] sm:$0xff pattern:$0x73625140]  ;;  %v53_v37 = vld.sshfl [vmem:[#allocation1 + $0x10] sm:$0xff pattern:$0x73625140]  ;;  %v65_v38 = vpack.c.bf16 %v51_v32, %v51_v32 }
  0x14   :  { %488 = vmatpush.bf16.msra.mxu1 %v1021_v13  ;;  %v66_v39 = vpack.c.bf16 %v52_v33, %v52_v33  ;;  %v1057_v41 = vld [vmem:[#allocation2 + $0x180] sm:$0xff]  ;;  %v54_v42 = vld.sshfl [vmem:[#allocation1 + $0x18] sm:$0xff pattern:$0x73625140]  ;;  %v67_v45 = vpack.c.bf16 %v53_v37, %v53_v37  ;;  %v1046_v47 = vld [vmem:[#allocation2 + $0x128] sm:$0xff] }
  0x15   :  { %501 = vmatpush.bf16.msra.mxu2 %v1029_v14  ;;  %v1055_v44 = vld [vmem:[#allocation2 + $0x170] sm:$0xff]  ;;  %v68_v46 = vpack.c.bf16 %v54_v42, %v54_v42  ;;  %v1054_v48 = vld [vmem:[#allocation2 + $0x168] sm:$0xff]  ;;  %v1045_v49 = vld [vmem:[#allocation2 + $0x120] sm:$0xff] }
  0x16   :  { %514 = vmatpush.bf16.msra.mxu3 %v1037_v16  ;;  %v1053_v50 = vld [vmem:[#allocation2 + $0x160] sm:$0xff]  ;;  %v1044_v51 = vld [vmem:[#allocation2 + $0x118] sm:$0xff]  ;;  %v57_v53 = vld.sshfl [vmem:[#allocation1 + $0x30] sm:$0xff pattern:$0x73625140] }
  0x17   :  { %476 = vmatpush.bf16.msra.mxu0 %v1012_v17  ;;  %v1052_v52 = vld [vmem:[#allocation2 + $0x158] sm:$0xff]  ;;  %v1043_v54 = vld [vmem:[#allocation2 + $0x110] sm:$0xff]  ;;  %v71_v56 = vpack.c.bf16 %v57_v53, %v57_v53  ;;  %v1042_v57 = vld [vmem:[#allocation2 + $0x108] sm:$0xff] }
  0x18   :  { %489 = vmatpush.bf16.msra.mxu1 %v1020_v18  ;;  %v1051_v55 = vld [vmem:[#allocation2 + $0x150] sm:$0xff]  ;;  %v1050_v58 = vld [vmem:[#allocation2 + $0x148] sm:$0xff]  ;;  %v1041_v59 = vld [vmem:[#allocation2 + $0x100] sm:$0xff] }
  0x19   :  { %502 = vmatpush.bf16.msra.mxu2 %v1028_v20  ;;  %v1049_v60 = vld [vmem:[#allocation2 + $0x140] sm:$0xff]  ;;  %v55_v61 = vld.sshfl [vmem:[#allocation1 + $0x20] sm:$0xff pattern:$0x73625140]  ;;  %v1065_v1 = vld [vmem:[%s1249_s3 + $0x38] sm:$0xff] }
  0x1a   :  { %515 = vmatpush.bf16.msra.mxu3 %v1036_v21  ;;  %v56_v62 = vld.sshfl [vmem:[#allocation1 + $0x28] sm:$0xff pattern:$0x73625140]  ;;  %v69_v63 = vpack.c.bf16 %v55_v61, %v55_v61  ;;  %v1064_v2 = vld [vmem:[%s1249_s3 + $0x30] sm:$0xff]  ;;  %v1062_v4 = vld [vmem:[%s1249_s3 + $0x20] sm:$0xff] }
  0x1b   :  { %477 = vmatpush.bf16.msra.mxu0 %v1011_v22  ;;  %v70_v0 = vpack.c.bf16 %v56_v62, %v56_v62  ;;  %v1063_v3 = vld [vmem:[%s1249_s3 + $0x28] sm:$0xff]  ;;  %v1061_v5 = vld [vmem:[%s1249_s3 + $0x18] sm:$0xff]  ;;  %v1060_v6 = vld [vmem:[%s1249_s3 + $0x10] sm:$0xff] }
  0x1c   :  { %490 = vmatpush.bf16.msra.mxu1 %v1019_v23  ;;  %v1059_v7 = vld [vmem:[%s1249_s3 + $0x8] sm:$0xff]  ;;  %v1058_v10 = vld [vmem:[%s1249_s3] sm:$0xff]  ;;  %v1073_v13 = vld [vmem:[%s1251_s5 + $0x38] sm:$0xff] }
  0x1d   :  { %503 = vmatpush.bf16.msra.mxu2 %v1027_v24  ;;  %v1072_v16 = vld [vmem:[%s1251_s5 + $0x30] sm:$0xff]  ;;  %v1078_v17 = vld [vmem:[%s1248_s2] ss:$0 sm:$0xff]  ;;  %v1071_v18 = vld [vmem:[%s1251_s5 + $0x28] sm:$0xff] }
  0x1e   :  { %516 = vmatpush.bf16.msra.mxu3 %v1035_v25  ;;  %v1070_v22 = vld [vmem:[%s1251_s5 + $0x20] sm:$0xff]  ;;  %v1069_v24 = vld [vmem:[%s1251_s5 + $0x18] sm:$0xff] }
  0x1f   :  { %478 = vmatpush.bf16.msra.mxu0 %v1010_v26 }
  0x20   :  { %491 = vmatpush.bf16.msra.mxu1 %v1018_v27  ;;  %v1068_v27 = vld [vmem:[%s1251_s5 + $0x10] sm:$0xff] }
  0x21   :  { %504 = vmatpush.bf16.msra.mxu2 %v1026_v28 }
  0x22   :  { %517 = vmatpush.bf16.msra.mxu3 %v1034_v31 }
  0x23   :  { %479 = vmatpush.bf16.msra.mxu0 %v1009_v29 }
  0x24   :  { %492 = vmatpush.bf16.msra.mxu1 %v1017_v30 }
  0x25   :  { %505 = vmatpush.bf16.msra.mxu2 %v1025_v36 }
  0x26   :  { %480 = vmatmul.bf16.vlgmr.msra.gmra.mxu0 %v65_v38  ;;  %518 = vmatpush.bf16.msra.mxu3 %v1033_v40  ;;  %v1066_v40 = vld [vmem:[%s1251_s5] sm:$0xff] }
  0x27   :  { %524 = vmatpush.bf16.msrb.mxu0 %v1048_v34  ;;  %493 = vmatmul.bf16.vlgmr.msra.gmra.mxu1 %v66_v39  ;;  %v1067_v39 = vld [vmem:[%s1251_s5 + $0x8] sm:$0xff]  ;;  %s738_s5 = sshll.u32 %s1253_s7, 4  ;;  %s739_s5 = int_to_ptr.hbm [resolvable:$true] %s738_s5 }
  0x28   :  { %537 = vmatpush.bf16.msrb.mxu1 %v1056_v35  ;;  %506 = vmatmul.bf16.vlgmr.msra.gmra.mxu2 %v67_v45 }
  0x29   :  { %557 = vmatpush.bf16.msrb.mxu2 %v1057_v41  ;;  %519 = vmatmul.bf16.vlgmr.msra.gmra.mxu3 %v68_v46  ;;  %v1079_v41 = vld [vmem:[%s1250_s4] ss:$0 sm:$0xff] }
  0x2a   :  { %633 = vmatpush.bf16.msrb.mxu3 %v1065_v1 }
  0x2b   :  { %525 = vmatpush.bf16.msrb.mxu0 %v1047_v43 }
  0x2c   :  { %538 = vmatpush.bf16.msrb.mxu1 %v1055_v44 }
  0x2d   :  { %716 = vmatpush.bf16.msra.mxu2 %v1073_v13 }
  0x2e   :  { %634 = vmatpush.bf16.msrb.mxu3 %v1064_v2 }
  0x2f   :  { %526 = vmatpush.bf16.msrb.mxu0 %v1046_v47  ;;  %v1080_v47 = vld [vmem:[%s1252_s6] ss:$0 sm:$0xff] }
  0x30   :  { %539 = vmatpush.bf16.msrb.mxu1 %v1054_v48 }
  0x31   :  { %717 = vmatpush.bf16.msra.mxu2 %v1072_v16 }
  0x32   :  { %635 = vmatpush.bf16.msrb.mxu3 %v1063_v3 }
  0x33   :  { %527 = vmatpush.bf16.msrb.mxu0 %v1045_v49 }
  0x34   :  { %540 = vmatpush.bf16.msrb.mxu1 %v1053_v50 }
  0x35   :  { %718 = vmatpush.bf16.msra.mxu2 %v1071_v18 }
  0x36   :  { %636 = vmatpush.bf16.msrb.mxu3 %v1062_v4 }
  0x37   :  { %528 = vmatpush.bf16.msrb.mxu0 %v1044_v51 }
  0x38   :  { %541 = vmatpush.bf16.msrb.mxu1 %v1052_v52  ;;  %944 = vmatmul.msk.bf16.vlgmr.msrb.gmra.mxu2 %vm468_vm0, %v71_v56 }
  0x39   :  { %719 = vmatpush.bf16.msra.mxu2 %v1070_v22 }
  0x3a   :  { %637 = vmatpush.bf16.msrb.mxu3 %v1061_v5 }
  0x3b   :  { %529 = vmatpush.bf16.msrb.mxu0 %v1043_v54 }
  0x3c   :  { %542 = vmatpush.bf16.msrb.mxu1 %v1051_v55 }
  0x3d   :  { %720 = vmatpush.bf16.msra.mxu2 %v1069_v24 }
  0x3e   :  { %638 = vmatpush.bf16.msrb.mxu3 %v1060_v6 }
  0x3f   :  { %530 = vmatpush.bf16.msrb.mxu0 %v1042_v57 }
  0x40   :  { %543 = vmatpush.bf16.msrb.mxu1 %v1050_v58 }
  0x41   :  { %721 = vmatpush.bf16.msra.mxu2 %v1068_v27 }
  0x42   :  { %639 = vmatpush.bf16.msrb.mxu3 %v1059_v7 }
  0x43   :  { %531 = vmatpush.bf16.msrb.mxu0 %v1041_v59 }
  0x44   :  { %544 = vmatpush.bf16.msrb.mxu1 %v1049_v60 }
  0x45   :  { %722 = vmatpush.bf16.msra.mxu2 %v1067_v39 }
  0x46   :  { %532 = vmatmul.bf16.vlgmr.msrb.gmra.mxu0 %v69_v63  ;;  %640 = vmatpush.bf16.msrb.mxu3 %v1058_v10 }
  0x47   :  { %545 = vmatmul.bf16.vlgmr.msrb.gmra.mxu1 %v70_v0 }
  0x49   :  { %723 = vmatpush.bf16.msra.mxu2 %v1066_v40 }
  0xa3   :  { %v481_v8 = vpop.f32.mrf.mxu0 }
  0xa4   :  { %v494_v9 = vpop.f32.mrf.mxu1  ;;  %v482_v19 = vadd.f32 %v1078_v17, %v481_v8 }
  0xa6   :  { %v495_v23 = vadd.f32 %v494_v9, %v482_v19 }
  0xab   :  { %v483_v11 = vpop.f32.mrf.mxu0  ;;  %v507_v14 = vpop.f32.mrf.mxu2 }
  0xac   :  { %v496_v12 = vpop.f32.mrf.mxu1  ;;  %v520_v15 = vpop.f32.mrf.mxu3  ;;  %v508_v25 = vadd.f32 %v507_v14, %v495_v23 }
  0xae   :  { %v521_v28 = vadd.f32 %v520_v15, %v508_v25 }
  0xb3   :  { %v509_v20 = vpop.f32.mrf.mxu2 }
  0xb4   :  { %v522_v21 = vpop.f32.mrf.mxu3 }
  0xbb   :  { %v559_v26 = vpop.f32.mrf.mxu2 }
  0xc3   :  { %v533_v29 = vpop.f32.mrf.mxu0  ;;  %v561_v33 = vpop.f32.mrf.mxu2 }
  0xc4   :  { %v546_v30 = vpop.f32.mrf.mxu1  ;;  %v534_v31 = vadd.f32 %v533_v29, %v521_v28 }
  0xc6   :  { %v547_v32 = vadd.f32 %v546_v30, %v534_v31 }
  0xc8   :  { %v560_v34 = vadd.f32 %v559_v26, %v547_v32 }
  0xca   :  { %v563_v35 = vmax.f32 %v560_v34, 0.0 }
  0xcb   :  { %v535_v36 = vpop.f32.mrf.mxu0 }
  0xcc   :  { %v548_v37 = vpop.f32.mrf.mxu1  ;;  %v564_v38 = vpack.c.bf16 %v563_v35, %v563_v35 }
  0xce   :  { %641 = vmatmul.bf16.vlgmr.msrb.gmra.mxu3 %v564_v38 }
 0x151   :  { %v642_v42 = vpop.f32.mrf.mxu3 }
 0x152   :  { %v643_v43 = vadd.f32 %v1079_v41, %v642_v42 }
 0x154   :  { %v646_v44 = vmax.f32 %v643_v43, 0.0 }
 0x156   :  { %v647_v45 = vpack.c.bf16 %v646_v44, %v646_v44 }
 0x158   :  { %724 = vmatmul.bf16.vlgmr.msra.gmra.mxu2 %v647_v45 }
 0x159   :  { %v644_v46 = vpop.f32.mrf.mxu3 }
 0x1db   :  { %v725_v48 = vpop.f32.mrf.mxu2 }
 0x1dc   :  { %v726_v49 = vadd.f32 %v1080_v47, %v725_v48 }
 0x1de   :  { %730 = vst.msk [vmem:[#allocation5] sm:$0x3] %vm729_vm1, %v726_v49 }
 0x1df   :  { %741 = dma.vmem_to_hbm [thread:$0]  %s737_s22, 32, %s739_s5, [#allocation4]  }
 0x1e3   :  { %v727_v50 = vpop.f32.mrf.mxu2 }
 0x1e4   :  { %1131 = dma.done.wait [#allocation4], 32  }
 0x1e5   :  { %1132 = vsyncadd [#allocation4], 4294967264 }
 0x1e6   :  { %746 = vsyncpa [#allocation3], 1 }
 0x1e7   :  { %747 = vsyncpa [#allocation4], 1 }

</bundles_post_ra>
